<compile_context>
chip_gen: v7x
topology: tpu7x:2x2x1
jax: 0.10.0
libtpu: 0.0.40
codegen_flags: <defaults>
</compile_context>

<pallas_src>
import jax
import jax.numpy as jnp
from jax import lax
from jax.experimental import pallas as pl
from jax.experimental.pallas import tpu as pltpu


def _round_up(a, b):
    return (a + b - 1) // b * b


def ffn_kernel(x_ref, w1_ref, b1_ref, w2_ref, b2_ref, o_ref, acc_ref):
    # x_ref : (tm, dmp)   compute dtype (bf16 by default)
    # w1_ref: (tk, dmp)   W1 ff-chunk (PyTorch out_features x in_features layout)
    # b1_ref: (1, tk)     f32 bias chunk
    # w2_ref: (dmp, tk)   W2 ff-chunk
    # b2_ref: (1, dmp)    f32 bias
    # o_ref : (tm, dmp)   output tile (written on last ff-chunk only)
    # acc_ref:(tm, dmp)   f32 VMEM accumulator, resident across the ff axis
    k = pl.program_id(1)

    @pl.when(k == 0)
    def _():
        acc_ref[...] = jnp.zeros_like(acc_ref)

    # h_c = relu(x @ W1_c^T + b1_c): contract x's last dim with W1's last dim
    # (in_features) so no transpose of the PyTorch-layout weight is needed.
    h = lax.dot_general(
        x_ref[...], w1_ref[...],
        dimension_numbers=(((1,), (1,)), ((), ())),
        preferred_element_type=jnp.float32)              # (tm, tk) f32 acc on MXU
    h = jnp.maximum(h + b1_ref[...], 0.0)                # bias + ReLU in f32 (VPU)
    # TODO(synk): training-mode dropout (p=0.1) omitted — inference semantics (identity).

    # acc += h_c @ W2_c^T: contract over the ff-chunk dim.
    acc_ref[...] += lax.dot_general(
        h.astype(w2_ref.dtype), w2_ref[...],
        dimension_numbers=(((1,), (1,)), ((), ())),
        preferred_element_type=jnp.float32)

    @pl.when(k == pl.num_programs(1) - 1)
    def _():
        # b2 broadcast happens once per output tile, not per ff-chunk.
        o_ref[...] = (acc_ref[...] + b2_ref[...]).astype(o_ref.dtype)


def positionwise_feed_forward(x, w1, b1, w2, b2, *, tm=256, tk=512,
                              compute_dtype=jnp.bfloat16):
    """x: [..., d_model]; w1: [d_ff, d_model]; b1: [d_ff];
       w2: [d_model, d_ff]; b2: [d_model]   (PyTorch nn.Linear weight layout).
    Matmuls run in `compute_dtype` with f32 accumulation; output keeps x.dtype."""
    d_model = x.shape[-1]
    d_ff = w1.shape[0]
    lead_shape = x.shape[:-1]
    out_dtype = x.dtype

    x2 = x.reshape(-1, d_model)
    n_tok = x2.shape[0]

    # ---- tile sizes: MXU-friendly, clamped for small demo shapes ----
    tm_eff = min(tm, _round_up(n_tok, 8))          # row tile (>= 8, <= tm)
    n_pad = _round_up(n_tok, tm_eff)
    tk_eff = min(tk, _round_up(d_ff, 128))         # lane-dense ff chunk
    d_ff_pad = _round_up(d_ff, tk_eff)
    dmp = _round_up(d_model, 128)                  # lane-dense d_model

    # ---- zero-padding (exact no-op for the math; padding sliced off after) ----
    if n_pad != n_tok or dmp != d_model:
        x2 = jnp.pad(x2, ((0, n_pad - n_tok), (0, dmp - d_model)))
    if d_ff_pad != d_ff or dmp != d_model:
        w1 = jnp.pad(w1, ((0, d_ff_pad - d_ff), (0, dmp - d_model)))
        b1 = jnp.pad(b1, (0, d_ff_pad - d_ff))
        w2 = jnp.pad(w2, ((0, dmp - d_model), (0, d_ff_pad - d_ff)))
        b2 = jnp.pad(b2, (0, dmp - d_model))

    # ---- cast matmul operands once; biases stay f32 for the epilogue ----
    x2c = x2.astype(compute_dtype)
    w1c = w1.astype(compute_dtype)                 # (d_ff_pad, dmp), no .T
    w2c = w2.astype(compute_dtype)                 # (dmp, d_ff_pad)
    b1_2d = b1.reshape(1, d_ff_pad).astype(jnp.float32)
    b2_2d = b2.reshape(1, dmp).astype(jnp.float32)

    grid = (n_pad // tm_eff, d_ff_pad // tk_eff)   # reduction (ff) axis last
    n_row_tiles = grid[0]

    itemsize = jnp.dtype(compute_dtype).itemsize
    cost = pl.CostEstimate(
        flops=4 * n_pad * dmp * d_ff_pad,          # two matmuls, 2 flops/MAC each
        transcendentals=0,
        bytes_accessed=(n_pad * dmp * itemsize                      # x
                        + n_row_tiles * 2 * d_ff_pad * dmp * itemsize  # W1+W2 per row tile
                        + n_pad * dmp * jnp.dtype(out_dtype).itemsize))  # out

    out2 = pl.pallas_call(
        ffn_kernel,
        out_shape=jax.ShapeDtypeStruct((n_pad, dmp), out_dtype),
        grid_spec=pltpu.PrefetchScalarGridSpec(
            num_scalar_prefetch=0,
            grid=grid,
            in_specs=[
                pl.BlockSpec((tm_eff, dmp),    lambda i, k: (i, 0)),   # x rows
                pl.BlockSpec((tk_eff, dmp),    lambda i, k: (k, 0)),   # W1 chunk
                pl.BlockSpec((1, tk_eff),      lambda i, k: (0, k)),   # b1 chunk
                pl.BlockSpec((dmp, tk_eff),    lambda i, k: (0, k)),   # W2 chunk
                pl.BlockSpec((1, dmp),         lambda i, k: (0, 0)),   # b2
            ],
            out_specs=pl.BlockSpec((tm_eff, dmp), lambda i, k: (i, 0)),
            scratch_shapes=[pltpu.VMEM((tm_eff, dmp), jnp.float32)],
        ),
        compiler_params=pltpu.CompilerParams(
            dimension_semantics=("parallel", "arbitrary"),
            vmem_limit_bytes=64 * 1024 * 1024,
        ),
        cost_estimate=cost,
    )(x2c, w1c, b1_2d, w2c, b2_2d)

    if n_pad != n_tok or dmp != d_model:
        out2 = out2[:n_tok, :d_model]
    return out2.reshape(*lead_shape, d_model)


def init_params(key, d_model, d_ff, dtype=jnp.float32):
    """Deterministic init mimicking nn.Linear default (uniform +- 1/sqrt(fan_in))."""
    k1, k2, k3, k4 = jax.random.split(key, 4)
    bound1 = 1.0 / (d_model ** 0.5)
    bound2 = 1.0 / (d_ff ** 0.5)
    w1 = jax.random.uniform(k1, (d_ff, d_model), dtype, -bound1, bound1)
    b1 = jax.random.uniform(k2, (d_ff,), dtype, -bound1, bound1)
    w2 = jax.random.uniform(k3, (d_model, d_ff), dtype, -bound2, bound2)
    b2 = jax.random.uniform(k4, (d_model,), dtype, -bound2, bound2)
    return w1, b1, w2, b2


if __name__ == "__main__":
    batch, seq, d_model, d_ff = 2, 8, 32, 64
    key = jax.random.PRNGKey(0)
    kx, kp = jax.random.split(key)
    x = jax.random.normal(kx, (batch, seq, d_model), jnp.float32)
    w1, b1, w2, b2 = init_params(kp, d_model, d_ff)

    # Reference in plain JAX (same inference semantics: dropout is identity).
    ref = jnp.maximum(x @ w1.T + b1, 0.0) @ w2.T + b2

    # Default mixed-precision path (bf16 operands, f32 accumulation).
    out_bf16 = positionwise_feed_forward(x, w1, b1, w2, b2)
    out_bf16 = jax.block_until_ready(out_bf16)
    assert out_bf16.shape == (batch, seq, d_model)
    assert jnp.allclose(out_bf16, ref, atol=3e-2, rtol=3e-2)

    # Full-f32 path for a tight numerical check of the tiling/accumulation.
    out_f32 = positionwise_feed_forward(x, w1, b1, w2, b2,
                                        compute_dtype=jnp.float32)
    out_f32 = jax.block_until_ready(out_f32)
    assert jnp.allclose(out_f32, ref, atol=1e-4, rtol=1e-4)

    print("KERNEL_OK")
</pallas_src>

<mosaic_0001>
module attributes {stable_mosaic.version = 11 : i64} {
  func.func @ffn_kernel(%arg0: i32, %arg1: i32, %arg2: memref<16x128xbf16, #tpu.memory_space<vmem>>, %arg3: memref<128x128xbf16, #tpu.memory_space<vmem>>, %arg4: memref<1x128xf32, #tpu.memory_space<vmem>>, %arg5: memref<128x128xbf16, #tpu.memory_space<vmem>>, %arg6: memref<1x128xf32, #tpu.memory_space<vmem>>, %arg7: memref<16x128xf32, #tpu.memory_space<vmem>>, %arg8: memref<16x128xf32, #tpu.memory_space<vmem>>) attributes {dimension_semantics = [#tpu.dimension_semantics<parallel>, #tpu.dimension_semantics<arbitrary>], iteration_bounds = array<i64: 1, 1>, scalar_prefetch = 0 : i64, scratch_operands = 1 : i64, tpu.core_type = #tpu.core_type<tc>, window_params = [{transform_indices = @transform_0, window_bounds = array<i64: 16, 128>}, {transform_indices = @transform_1, window_bounds = array<i64: 128, 128>}, {transform_indices = @transform_2, window_bounds = array<i64: 1, 128>}, {transform_indices = @transform_3, window_bounds = array<i64: 128, 128>}, {pipeline_mode = #tpu.pipeline_mode<synchronous>, transform_indices = @transform_4, window_bounds = array<i64: 1, 128>}, {transform_indices = @transform_5, window_bounds = array<i64: 16, 128>}]} {
    %c0_i32 = arith.constant 0 : i32
    %0 = arith.cmpi eq, %arg1, %c0_i32 : i32
    %1 = arith.extui %0 : i1 to i32
    %c0_i32_0 = arith.constant 0 : i32
    %2 = arith.cmpi ne, %1, %c0_i32_0 : i32
    scf.if %2 {
      %cst_16 = arith.constant 0.000000e+00 : f32
      %20 = vector.broadcast %cst_16 : f32 to vector<16x128xf32>
      %c0_17 = arith.constant 0 : index
      %c0_18 = arith.constant 0 : index
      %21 = vector.load %arg8[%c0_17, %c0_18] : memref<16x128xf32, #tpu.memory_space<vmem>>, vector<16x128xf32>
      tpu.vector_store %arg8[%c0_17, %c0_18], %20 {strides = array<i32>} : memref<16x128xf32, #tpu.memory_space<vmem>>, vector<16x128xf32>,
    } else {
    }
    %c0 = arith.constant 0 : index
    %c0_1 = arith.constant 0 : index
    %3 = vector.load %arg2[%c0, %c0_1] : memref<16x128xbf16, #tpu.memory_space<vmem>>, vector<16x128xbf16>
    %c0_2 = arith.constant 0 : index
    %c0_3 = arith.constant 0 : index
    %4 = vector.load %arg3[%c0_2, %c0_3] : memref<128x128xbf16, #tpu.memory_space<vmem>>, vector<128x128xbf16>
    %cst = arith.constant dense<0.000000e+00> : vector<16x128xf32>
    %5 = tpu.matmul %3, %4, %cst {dimension_numbers = #tpu.dot_dimension_numbers<[1], [1], [0], [0], [0, 0, 1, 0], [], []>} : vector<16x128xbf16>, vector<128x128xbf16>, vector<16x128xf32> -> vector<16x128xf32>
    %c0_4 = arith.constant 0 : index
    %c0_5 = arith.constant 0 : index
    %6 = vector.load %arg4[%c0_4, %c0_5] : memref<1x128xf32, #tpu.memory_space<vmem>>, vector<1x128xf32>
    %7 = vector.broadcast %6 : vector<1x128xf32> to vector<16x128xf32>
    %8 = arith.addf %5, %7 : vector<16x128xf32>
    %cst_6 = arith.constant 0.000000e+00 : f32
    %9 = vector.broadcast %cst_6 : f32 to vector<16x128xf32>
    %10 = arith.maximumf %8, %9 : vector<16x128xf32>
    %c0_7 = arith.constant 0 : index
    %c0_8 = arith.constant 0 : index
    %11 = vector.load %arg8[%c0_7, %c0_8] : memref<16x128xf32, #tpu.memory_space<vmem>>, vector<16x128xf32>
    %12 = arith.truncf %10 : vector<16x128xf32> to vector<16x128xbf16>
    %c0_9 = arith.constant 0 : index
    %c0_10 = arith.constant 0 : index
    %13 = vector.load %arg5[%c0_9, %c0_10] : memref<128x128xbf16, #tpu.memory_space<vmem>>, vector<128x128xbf16>
    %cst_11 = arith.constant dense<0.000000e+00> : vector<16x128xf32>
    %14 = tpu.matmul %12, %13, %cst_11 {dimension_numbers = #tpu.dot_dimension_numbers<[1], [1], [0], [0], [0, 0, 1, 0], [], []>} : vector<16x128xbf16>, vector<128x128xbf16>, vector<16x128xf32> -> vector<16x128xf32>
    %15 = arith.addf %11, %14 : vector<16x128xf32>
    %c0_12 = arith.constant 0 : index
    %c0_13 = arith.constant 0 : index
    %16 = vector.load %arg8[%c0_12, %c0_13] : memref<16x128xf32, #tpu.memory_space<vmem>>, vector<16x128xf32>
    tpu.vector_store %arg8[%c0_12, %c0_13], %15 {strides = array<i32>} : memref<16x128xf32, #tpu.memory_space<vmem>>, vector<16x128xf32>,
    %c0_i32_14 = arith.constant 0 : i32
    %17 = arith.cmpi eq, %arg1, %c0_i32_14 : i32
    %18 = arith.extui %17 : i1 to i32
    %c0_i32_15 = arith.constant 0 : i32
    %19 = arith.cmpi ne, %18, %c0_i32_15 : i32
    scf.if %19 {
      %c0_16 = arith.constant 0 : index
      %c0_17 = arith.constant 0 : index
      %20 = vector.load %arg8[%c0_16, %c0_17] : memref<16x128xf32, #tpu.memory_space<vmem>>, vector<16x128xf32>
      %c0_18 = arith.constant 0 : index
      %c0_19 = arith.constant 0 : index
      %21 = vector.load %arg6[%c0_18, %c0_19] : memref<1x128xf32, #tpu.memory_space<vmem>>, vector<1x128xf32>
      %22 = vector.broadcast %21 : vector<1x128xf32> to vector<16x128xf32>
      %23 = arith.addf %20, %22 : vector<16x128xf32>
      %c0_20 = arith.constant 0 : index
      %c0_21 = arith.constant 0 : index
      %24 = vector.load %arg7[%c0_20, %c0_21] : memref<16x128xf32, #tpu.memory_space<vmem>>, vector<16x128xf32>
      tpu.vector_store %arg7[%c0_20, %c0_21], %23 {strides = array<i32>} : memref<16x128xf32, #tpu.memory_space<vmem>>, vector<16x128xf32>,
    } else {
    }
    return
  }
  func.func @transform_0(%arg0: i32, %arg1: i32) -> (i32, i32) {
    %c0_i32 = arith.constant 0 : i32
    %c0_i32_0 = arith.constant 0 : i32
    return %arg0, %c0_i32 : i32, i32
  }
  func.func @transform_1(%arg0: i32, %arg1: i32) -> (i32, i32) {
    %c0_i32 = arith.constant 0 : i32
    %c0_i32_0 = arith.constant 0 : i32
    return %arg1, %c0_i32 : i32, i32
  }
  func.func @transform_2(%arg0: i32, %arg1: i32) -> (i32, i32) {
    %c0_i32 = arith.constant 0 : i32
    %c0_i32_0 = arith.constant 0 : i32
    return %c0_i32, %arg1 : i32, i32
  }
  func.func @transform_3(%arg0: i32, %arg1: i32) -> (i32, i32) {
    %c0_i32 = arith.constant 0 : i32
    %c0_i32_0 = arith.constant 0 : i32
    return %c0_i32, %arg1 : i32, i32
  }
  func.func @transform_4(%arg0: i32, %arg1: i32) -> (i32, i32) {
    %c0_i32 = arith.constant 0 : i32
    %c0_i32_0 = arith.constant 0 : i32
    %c0_i32_1 = arith.constant 0 : i32
    return %c0_i32, %c0_i32_0 : i32, i32
  }
  func.func @transform_5(%arg0: i32, %arg1: i32) -> (i32, i32) {
    %c0_i32 = arith.constant 0 : i32
    %c0_i32_0 = arith.constant 0 : i32
    return %arg0, %c0_i32 : i32, i32
  }
}

</mosaic_0001>

<bundles_post_ra>
// kernel: tpu_custom_call.1
= control target key start
LH: loop header
LB: loop body
LE: loop exit
PB: predicated region body
PF: predicated region fallthrough
CT: control target
= control target key end

     0   :  { %10 = vsyncpa [#allocation4], 0  ;;  %s737_s0 = inlined_call_operand.hbm [shape: bf16[16,128], index: 0, kind: input, shape index: {}]   ;;  %s738_s1 = inlined_call_operand.hbm [shape: bf16[128,128], index: 1, kind: input, shape index: {}]   ;;  %s739_s2 = inlined_call_operand.hbm [shape: f32[1,128], index: 2, kind: input, shape index: {}]   ;;  %s740_s3 = inlined_call_operand.hbm [shape: bf16[128,128], index: 3, kind: input, shape index: {}]   ;;  %s741_s4 = inlined_call_operand.hbm [shape: f32[1,128], index: 4, kind: input, shape index: {}]   ;;  %s742_s5 = inlined_call_operand.hbm [shape: f32[16,128], index: 5, kind: output, shape index: {}]  }
   0x1   :  { %11 = vsyncpa [#allocation7], 0 }
   0x2   :  { %12 = vsyncpa [#allocation10], 0 }
   0x3   :  { %13 = vsyncpa [#allocation5], 0  ;;  %s607_s18 = smov [#allocation6]   ;;  %s608_s20 = smov [#allocation9]  }
   0x4   :  { %s31_s19 = sshll.u32 %s607_s18, 4  ;;  %s53_s21 = sshll.u32 %s608_s20, 4  ;;  %s32_s19 = int_to_ptr.vmem [resolvable:$true] %s31_s19  ;;  %s649_s21 = int_to_ptr.vmem [resolvable:$true] %s53_s21 }
   0x5   :  { %s467_s24 = scalar_lea.hbm %s738_s1, 1024 }
   0x6   :  { %p468_p0 = scmp.ne.s32.totalorder %s738_s1, %s467_s24  ;;  %p471_p1 = scmp.lt.u32.totalorder %s467_s24, %s738_s1 }
   0x8   :  { %p473_p2 = pnand %p471_p1, %p468_p0 }
   0xa   :  { %476 = shalt.err (!%p473_p2)
}
   0xb   :  { %s477_s29 = scalar_lea.vmem %s32_s19, 1024  ;;  %p482_p4 = scmp.lt.s32.totalorder %s32_s19, %s32_s19 }
   0xc   :  { %p478_p3 = scmp.ne.s32.totalorder %s32_s19, %s477_s29  ;;  %p483_p5 = scmp.lt.s32.totalorder %s477_s29, %s477_s29 }
   0xe   :  { %p484_p6 = por %p483_p5, %p482_p4 }
  0x10   :  { %p485_p7 = pnand %p484_p6, %p478_p3 }
  0x12   :  { %488 = shalt.err (!%p485_p7)
}
  0x13   :  { %s609_s30 = smov 64   ;;  %s610_s6 = smov 4  }
  0x14   :  { %37 = dma.hbm_to_vmem [thread:$0]  %s738_s1, 1024, %s32_s19, [#allocation7], %s609_s30, %s609_s30, %s610_s6  }
  0x15   :  { %s489_s11 = scalar_lea.hbm %s740_s3, 1024 }
  0x16   :  { %p490_p8 = scmp.ne.s32.totalorder %s740_s3, %s489_s11  ;;  %p493_p9 = scmp.lt.u32.totalorder %s489_s11, %s740_s3 }
  0x18   :  { %p495_p10 = pnand %p493_p9, %p490_p8 }
  0x1a   :  { %498 = shalt.err (!%p495_p10)
}
  0x1b   :  { %s499_s16 = scalar_lea.vmem %s649_s21, 1024  ;;  %p504_p12 = scmp.lt.s32.totalorder %s649_s21, %s649_s21 }
  0x1c   :  { %p500_p11 = scmp.ne.s32.totalorder %s649_s21, %s499_s16  ;;  %p505_p13 = scmp.lt.s32.totalorder %s499_s16, %s499_s16 }
  0x1e   :  { %p506_p0 = por %p505_p13, %p504_p12 }
  0x20   :  { %p507_p1 = pnand %p506_p0, %p500_p11 }
  0x22   :  { %510 = shalt.err (!%p507_p1)
}
  0x23   :  { %59 = dma.hbm_to_vmem [thread:$0]  %s740_s3, 1024, %s649_s21, [#allocation10], %s609_s30, %s609_s30, %s610_s6  }
  0x24   :  { %s611_s18 = smov [#allocation3]   ;;  %s612_s20 = smov [#allocation8]  }
  0x25   :  { %s19_s19 = sshll.u32 %s611_s18, 4  ;;  %s44_s22 = sshll.u32 %s612_s20, 4  ;;  %s20_s19 = int_to_ptr.vmem [resolvable:$true] %s19_s19  ;;  %s45_s22 = int_to_ptr.vmem [resolvable:$true] %s44_s22 }
  0x26   :  { %s511_s25 = scalar_lea.hbm %s737_s0, 128 }
  0x27   :  { %p512_p2 = scmp.ne.s32.totalorder %s737_s0, %s511_s25  ;;  %p515_p3 = scmp.lt.u32.totalorder %s511_s25, %s737_s0 }
  0x29   :  { %p517_p4 = pnand %p515_p3, %p512_p2 }
  0x2b   :  { %520 = shalt.err (!%p517_p4)
}
  0x2c   :  { %s521_s3 = scalar_lea.vmem %s20_s19, 128  ;;  %p526_p6 = scmp.lt.s32.totalorder %s20_s19, %s20_s19 }
  0x2d   :  { %p522_p5 = scmp.ne.s32.totalorder %s20_s19, %s521_s3  ;;  %p527_p7 = scmp.lt.s32.totalorder %s521_s3, %s521_s3 }
  0x2f   :  { %p528_p8 = por %p527_p7, %p526_p6 }
  0x31   :  { %p529_p9 = pnand %p528_p8, %p522_p5 }
  0x33   :  { %532 = shalt.err (!%p529_p9)
}
  0x34   :  { %25 = dma.hbm_to_vmem [thread:$0]  %s737_s0, 128, %s20_s19, [#allocation4], %s609_s30, %s609_s30, %s610_s6  }
  0x35   :  { %s533_s10 = scalar_lea.hbm %s739_s2, 16 }
  0x36   :  { %p534_p10 = scmp.ne.s32.totalorder %s739_s2, %s533_s10  ;;  %p537_p11 = scmp.lt.u32.totalorder %s533_s10, %s739_s2 }
  0x38   :  { %p539_p12 = pnand %p537_p11, %p534_p10 }
  0x3a   :  { %542 = shalt.err (!%p539_p12)
}
  0x3b   :  { %s543_s15 = scalar_lea.vmem %s45_s22, 16  ;;  %s547_s16 = scalar_lea.vmem %s45_s22, 32 }
  0x3c   :  { %p544_p13 = scmp.ne.s32.totalorder %s45_s22, %s543_s15  ;;  %p548_p0 = scmp.lt.s32.totalorder %s45_s22, %s45_s22 }
  0x3d   :  { %p549_p1 = scmp.lt.s32.totalorder %s547_s16, %s543_s15 }
  0x3f   :  { %p550_p2 = por %p549_p1, %p548_p0 }
  0x41   :  { %p551_p3 = pnand %p550_p2, %p544_p13 }
  0x43   :  { %554 = shalt.err (!%p551_p3)
}
  0x44   :  { %47 = dma.hbm_to_vmem [thread:$0]  %s739_s2, 16, %s45_s22, [#allocation7]  }
  0x45   :  { %s613_s6 = smov [#allocation11]   ;;  %s555_s19 = scalar_lea.hbm %s741_s4, 16 }
  0x46   :  { %s66_s1 = sshll.u32 %s613_s6, 4  ;;  %p556_p4 = scmp.ne.s32.totalorder %s741_s4, %s555_s19  ;;  %s67_s1 = int_to_ptr.vmem [resolvable:$true] %s66_s1 }
  0x47   :  { %p559_p5 = scmp.lt.u32.totalorder %s555_s19, %s741_s4 }
  0x49   :  { %p561_p6 = pnand %p559_p5, %p556_p4 }
  0x4b   :  { %564 = shalt.err (!%p561_p6)
}
  0x4c   :  { %s565_s26 = scalar_lea.vmem %s67_s1, 16  ;;  %s569_s2 = scalar_lea.vmem %s67_s1, 32 }
  0x4d   :  { %p566_p7 = scmp.ne.s32.totalorder %s67_s1, %s565_s26  ;;  %p570_p8 = scmp.lt.s32.totalorder %s67_s1, %s67_s1 }
  0x4e   :  { %p571_p9 = scmp.lt.s32.totalorder %s569_s2, %s565_s26 }
  0x50   :  { %p572_p10 = por %p571_p9, %p570_p8 }
  0x52   :  { %p573_p11 = pnand %p572_p10, %p566_p7 }
  0x54   :  { %576 = shalt.err (!%p573_p11)
}
  0x55   :  { %69 = dma.hbm_to_vmem [thread:$0]  %s741_s4, 16, %s67_s1, [#allocation10]  }
  0x56   :  { %599 = dma.done.wait [#allocation4], 128  }
  0x57   :  { %600 = vsyncadd [#allocation4], 4294967168 }
  0x58   :  { %601 = dma.done.wait [#allocation7], 1040  }
  0x59   :  { %602 = vsyncadd [#allocation7], 4294966256 }
  0x5a   :  { %603 = dma.done.wait [#allocation10], 1040  }
  0x5b   :  { %604 = vsyncadd [#allocation10], 4294966256  ;;  %v614_v0 = vmov 0.0   ;;  %vm615_vm0 = vmmov 0   ;;  %v450_v1 = vld [vmem:[#allocation6] sm:$0xff]   ;;  %v451_v2 = vld [vmem:[#allocation6 + $0x8] sm:$0xff]  }
  0x5c   :  { %398 = vmatprep.subr.bf16.mxu0 %v614_v0  ;;  %414 = vmatprep.mubr.msk.bf16.mxu0 %vm615_vm0, %v614_v0  ;;  %v459_v3 = vld [vmem:[#allocation9] sm:$0xff]   ;;  %v452_v4 = vld [vmem:[#allocation6 + $0x10] sm:$0xff]   ;;  %v453_v6 = vld [vmem:[#allocation6 + $0x18] sm:$0xff]   ;;  %s616_s4 = smov [#allocation12]  }
  0x5d   :  { %418 = vmatprep.subr.bf16.mxu1 %v614_v0  ;;  %434 = vmatprep.mubr.msk.bf16.mxu1 %vm615_vm0, %v614_v0  ;;  %v460_v5 = vld [vmem:[#allocation9 + $0x8] sm:$0xff]   ;;  %v461_v7 = vld [vmem:[#allocation9 + $0x10] sm:$0xff]   ;;  %v454_v8 = vld [vmem:[#allocation6 + $0x20] sm:$0xff]   ;;  %s347_s28 = sshll.u32 %s616_s4, 4  ;;  %s348_s28 = int_to_ptr.vmem [resolvable:$true] %s347_s28 }
  0x5e   :  { %399 = vmatpush3.bf16.xpose.msra.mxu0 %v450_v1  ;;  %419 = vmatpush3.bf16.xpose.msra.mxu1 %v459_v3  ;;  %v462_v9 = vld [vmem:[#allocation9 + $0x18] sm:$0xff]   ;;  %v455_v10 = vld [vmem:[#allocation6 + $0x28] sm:$0xff]   ;;  %v456_v12 = vld [vmem:[#allocation6 + $0x30] sm:$0xff]   ;;  %s577_s29 = scalar_lea.vmem %s348_s28, 256  ;;  %p582_p13 = scmp.lt.s32.totalorder %s348_s28, %s348_s28 }
  0x5f   :  { %400 = vmatprep.subr.bf16.mxu0 %v614_v0  ;;  %420 = vmatprep.subr.bf16.mxu1 %v614_v0  ;;  %v463_v11 = vld [vmem:[#allocation9 + $0x20] sm:$0xff]   ;;  %v464_v13 = vld [vmem:[#allocation9 + $0x28] sm:$0xff]   ;;  %v457_v14 = vld [vmem:[#allocation6 + $0x38] sm:$0xff]   ;;  %p578_p12 = scmp.ne.s32.totalorder %s348_s28, %s577_s29  ;;  %p583_p0 = scmp.lt.s32.totalorder %s577_s29, %s577_s29 }
  0x60   :  { %v465_v15 = vld [vmem:[#allocation9 + $0x30] sm:$0xff]   ;;  %v466_v17 = vld [vmem:[#allocation9 + $0x38] sm:$0xff]   ;;  %v379_v28 = vld [vmem:[#allocation11] ss:$0 sm:$0xff] }
  0x61   :  { %v458_v16 = vld [vmem:[#allocation3] sm:$0xff]   ;;  %v361_v18 = vld [vmem:[#allocation8] ss:$0 sm:$0xff]  ;;  %p584_p1 = por %p583_p0, %p582_p13 }
  0x63   :  { %p585_p2 = pnand %p584_p1, %p578_p12 }
  0x66   :  { %401 = vmatpush3.bf16.xpose.msra.mxu0 %v451_v2  ;;  %421 = vmatpush3.bf16.xpose.msra.mxu1 %v460_v5 }
  0x67   :  { %402 = vmatprep.subr.bf16.mxu0 %v614_v0  ;;  %422 = vmatprep.subr.bf16.mxu1 %v614_v0 }
  0x6e   :  { %403 = vmatpush3.bf16.xpose.msra.mxu0 %v452_v4  ;;  %423 = vmatpush3.bf16.xpose.msra.mxu1 %v461_v7 }
  0x6f   :  { %404 = vmatprep.subr.bf16.mxu0 %v614_v0  ;;  %424 = vmatprep.subr.bf16.mxu1 %v614_v0 }
  0x76   :  { %405 = vmatpush3.bf16.xpose.msra.mxu0 %v453_v6  ;;  %425 = vmatpush3.bf16.xpose.msra.mxu1 %v462_v9 }
  0x77   :  { %406 = vmatprep.subr.bf16.mxu0 %v614_v0  ;;  %426 = vmatprep.subr.bf16.mxu1 %v614_v0 }
  0x7e   :  { %407 = vmatpush3.bf16.xpose.msra.mxu0 %v454_v8  ;;  %427 = vmatpush3.bf16.xpose.msra.mxu1 %v463_v11 }
  0x7f   :  { %408 = vmatprep.subr.bf16.mxu0 %v614_v0  ;;  %428 = vmatprep.subr.bf16.mxu1 %v614_v0 }
  0x86   :  { %409 = vmatpush3.bf16.xpose.msra.mxu0 %v455_v10  ;;  %429 = vmatpush3.bf16.xpose.msra.mxu1 %v464_v13 }
  0x87   :  { %410 = vmatprep.subr.bf16.mxu0 %v614_v0  ;;  %430 = vmatprep.subr.bf16.mxu1 %v614_v0 }
  0x8e   :  { %411 = vmatpush3.bf16.xpose.msra.mxu0 %v456_v12  ;;  %431 = vmatpush3.bf16.xpose.msra.mxu1 %v465_v15 }
  0x8f   :  { %412 = vmatprep.subr.bf16.mxu0 %v614_v0  ;;  %432 = vmatprep.subr.bf16.mxu1 %v614_v0 }
  0x96   :  { %413 = vmatpush3.bf16.xpose.msra.mxu0 %v457_v14  ;;  %433 = vmatpush3.bf16.xpose.msra.mxu1 %v466_v17 }
  0x9d   :  { %415 = vmatmul.mubr.bf16.vlgmr.msra.gmra.mrb[0].mxu0 %v458_v16 }
 0x170   :  { %v205_v19 = vpop.f32.mrb[0].mxu0 }
 0x171   :  { %v206_v20 = vadd.f32 %v361_v18, %v205_v19  ;;  %v416_v21 = vpop.f32.mrb[1].mxu0 }
 0x172   :  { %v208_v22 = vpop.f32.mrb[2].mxu0 }
 0x173   :  { %v209_v23 = vadd.f32 %v361_v18, %v208_v22  ;;  %v417_v24 = vpop.f32.mrb[3].mxu0  ;;  %v212_v25 = vmax.f32 %v206_v20, 0.0 }
 0x175   :  { %v213_v26 = vmax.f32 %v209_v23, 0.0 }
 0x177   :  { %v216_v27 = vpack.c.bf16 %v213_v26, %v212_v25 }
 0x179   :  { %435 = vmatmul.mubr.bf16.vlgmr.msra.gmra.mrb[0].mxu1 %v216_v27 }
 0x24c   :  { %v315_v29 = vpop.f32.mrb[0].mxu1 }
 0x24d   :  { %v338_v30 = vadd.f32 %v379_v28, %v315_v29  ;;  %v436_v31 = vpop.f32.mrb[1].mxu1 }
 0x24e   :  { %v318_v32 = vpop.f32.mrb[2].mxu1 }
 0x24f   :  { %340 = vst [vmem:[#allocation12] sm:$0xff] %v338_v30  ;;  %v339_v33 = vadd.f32 %v379_v28, %v318_v32  ;;  %v437_v34 = vpop.f32.mrb[3].mxu1 }
 0x251   :  { %341 = vst [vmem:[#allocation12 + $0x8] sm:$0xff] %v339_v33 }
 0x252   :  { %588 = shalt.err (!%p585_p2)
}
 0x253   :  { %s589_s7 = scalar_lea.hbm %s742_s5, 256 }
 0x254   :  { %p590_p3 = scmp.ne.s32.totalorder %s742_s5, %s589_s7  ;;  %p593_p4 = scmp.lt.u32.totalorder %s589_s7, %s742_s5 }
 0x256   :  { %p595_p5 = pnand %p593_p4, %p590_p3 }
 0x258   :  { %598 = shalt.err (!%p595_p5)
}
 0x259   :  { %s617_s12 = smov 128   ;;  %s618_s13 = smov 8  }
 0x25a   :  { %353 = dma.vmem_to_hbm [thread:$0]  %s348_s28, 256, %s742_s5, [#allocation5], %s617_s12, %s617_s12, %s618_s13  }
 0x25b   :  { %605 = dma.done.wait [#allocation5], 256  }
 0x25c   :  { %606 = vsyncadd [#allocation5], 4294967040 }
 0x25d   :  { %357 = vsyncpa [#allocation4], 1 }
 0x25e   :  { %358 = vsyncpa [#allocation7], 1 }
 0x25f   :  { %359 = vsyncpa [#allocation10], 1 }
 0x260   :  { %360 = vsyncpa [#allocation5], 1 }

</bundles_post_ra>
